<compile_context>
chip_gen: v5e
topology: v5e:2x2
jax: 0.10.0
libtpu: 0.0.40
codegen_flags: <defaults>
</compile_context>

<pallas_src>
import functools

import jax
import jax.numpy as jnp
from jax.experimental import pallas as pl
from jax.experimental.pallas import tpu as pltpu


# ---------------------------------------------------------------------------
# Fused kernel: im2col matmul (conv-transpose) + bias + BatchNorm(train stats)
#               + LeakyReLU(0.2) + inverted dropout.  Layout: (Cout, M) with
#               M = N*Hout*Wout on the lane axis.
# ---------------------------------------------------------------------------
def _fused_block_kernel(patches_ref, w_ref, b_ref, gamma_ref, beta_ref, u_ref,
                        o_ref, *, use_dropout, dropval, eps):
    # Single MXU push: (Cout, K*K*Cin) @ (K*K*Cin, M) -> (Cout, M), f32 acc.
    acc = jnp.dot(w_ref[...], patches_ref[...],
                  preferred_element_type=jnp.float32)
    acc = acc + b_ref[...]                               # (Cout, 1) broadcast

    # BatchNorm2d training statistics over (N, H, W) == the lane axis.
    m = acc.shape[1]
    inv_m = jnp.float32(1.0 / m)
    mean = jnp.sum(acc, axis=1, keepdims=True) * inv_m
    centered = acc - mean
    var = jnp.sum(centered * centered, axis=1, keepdims=True) * inv_m
    inv_std = jax.lax.rsqrt(var + jnp.float32(eps))
    z = centered * (gamma_ref[...] * inv_std) + beta_ref[...]

    # LeakyReLU(0.2)
    z = jnp.where(z >= 0, z, jnp.float32(0.2) * z)

    if use_dropout:
        # Inverted dropout (training mode): keep with prob 1-p, scale by 1/(1-p)
        keep = u_ref[...] >= jnp.float32(dropval)
        z = jnp.where(keep, z * jnp.float32(1.0 / (1.0 - dropval)),
                      jnp.float32(0.0))

    o_ref[...] = z.astype(o_ref.dtype)


# ---------------------------------------------------------------------------
# Wrapper: layout transforms (NCHW <-> lane-dense), im2col, weight flip,
#          dropout mask generation, single pallas_call.
# ---------------------------------------------------------------------------
def block_cnn_up(x_nchw, params, *, kernel=3, stride=1, padding=0,
                 use_dropout=True, dropval=0.5, eps=1e-5, seed=0):
    assert stride == 1 and padding == 0, "specialized for stride=1, padding=0"
    K = kernel
    W = params["weight"]            # (Cin, Cout, K, K)  ConvTranspose2d layout
    b = params["bias"]              # (Cout,)
    gamma = params["gamma"]         # (Cout,)
    beta = params["beta"]           # (Cout,)

    N, Cin, H, Wd = x_nchw.shape
    Cout = W.shape[1]
    Hout, Wout = H + K - 1, Wd + K - 1
    M = N * Hout * Wout

    # ConvTranspose2d(stride=1, padding=0) == plain correlation of the fully
    # (K-1)-padded input with the spatially flipped kernel (in/out swapped).
    # im2col: patches[(kh*K + kw)*Cin + c, n*Hout*Wout + h*Wout + w]
    #            = x_pad[n, c, h + kh, w + kw]
    # TODO(synk): for large H*W the K^2 im2col expansion should be built
    # in-kernel from spatially tiled blocks instead of materialized by XLA.
    xb = x_nchw.astype(jnp.bfloat16)
    xp = jnp.pad(xb, ((0, 0), (0, 0), (K - 1, K - 1), (K - 1, K - 1)))
    cols = []
    for kh in range(K):
        for kw in range(K):
            win = xp[:, :, kh:kh + Hout, kw:kw + Wout]   # (N, Cin, Hout, Wout)
            cols.append(jnp.transpose(win, (1, 0, 2, 3)).reshape(Cin, M))
    patches = jnp.concatenate(cols, axis=0)              # (K*K*Cin, M)  bf16

    wmat = (jnp.flip(W, axis=(2, 3)).transpose(2, 3, 0, 1)   # (K, K, Cin, Cout)
            .reshape(K * K * Cin, Cout).T                    # (Cout, K*K*Cin)
            .astype(jnp.bfloat16))
    b2 = b.reshape(Cout, 1).astype(jnp.float32)
    g2 = gamma.reshape(Cout, 1).astype(jnp.float32)
    be2 = beta.reshape(Cout, 1).astype(jnp.float32)

    # TODO(synk): dropout mask uses jax.random in the wrapper (statistically a
    # Bernoulli(1-p) inverted dropout, not torch's RNG stream).  The on-chip
    # pltpu.prng_* path would remove this HBM read but has no CPU-interpret
    # lowering.
    if use_dropout:
        u = jax.random.uniform(jax.random.PRNGKey(seed), (Cout, M),
                               dtype=jnp.float32)
    else:
        u = jnp.zeros((Cout, M), jnp.float32)

    out2d = pl.pallas_call(
        functools.partial(_fused_block_kernel, use_dropout=use_dropout,
                          dropval=float(dropval), eps=float(eps)),
        out_shape=jax.ShapeDtypeStruct((Cout, M), jnp.float32),
        grid=(1,),
        in_specs=[
            pl.BlockSpec((K * K * Cin, M), lambda i: (0, 0)),
            pl.BlockSpec((Cout, K * K * Cin), lambda i: (0, 0)),
            pl.BlockSpec((Cout, 1), lambda i: (0, 0)),
            pl.BlockSpec((Cout, 1), lambda i: (0, 0)),
            pl.BlockSpec((Cout, 1), lambda i: (0, 0)),
            pl.BlockSpec((Cout, M), lambda i: (0, 0)),
        ],
        out_specs=pl.BlockSpec((Cout, M), lambda i: (0, 0)),
        compiler_params=pltpu.CompilerParams(
            dimension_semantics=("arbitrary",)),
    )(patches, wmat, b2, g2, be2, u)

    # (Cout, N*Hout*Wout) -> (N, Cout, Hout, Wout)
    return out2d.reshape(Cout, N, Hout, Wout).transpose(1, 0, 2, 3)


# ---------------------------------------------------------------------------
# Plain-JAX reference (dropout disabled) via the direct scatter formulation of
# ConvTranspose2d -- independent cross-check of the kernel math.  Inputs are
# bf16-rounded exactly as the kernel path rounds them.
# ---------------------------------------------------------------------------
def reference_no_dropout(x_nchw, params, *, K=3, eps=1e-5):
    Wq = params["weight"].astype(jnp.bfloat16).astype(jnp.float32)
    xq = x_nchw.astype(jnp.bfloat16).astype(jnp.float32)
    b, gamma, beta = params["bias"], params["gamma"], params["beta"]
    N, Cin, H, Wd = x_nchw.shape
    Cout = Wq.shape[1]
    Hout, Wout = H + K - 1, Wd + K - 1
    out = jnp.zeros((N, Cout, Hout, Wout), jnp.float32)
    for kh in range(K):
        for kw in range(K):
            contrib = jnp.einsum('nchw,cd->ndhw', xq, Wq[:, :, kh, kw])
            out = out.at[:, :, kh:kh + H, kw:kw + Wd].add(contrib)
    out = out + b[None, :, None, None]
    mean = out.mean(axis=(0, 2, 3), keepdims=True)
    var = out.var(axis=(0, 2, 3), keepdims=True)     # biased, as BN training
    z = (out - mean) / jnp.sqrt(var + eps)
    z = z * gamma[None, :, None, None] + beta[None, :, None, None]
    return jnp.where(z >= 0, z, 0.2 * z)


if __name__ == "__main__":
    key = jax.random.PRNGKey(0)
    kx, kw, kb, kg, kbe = jax.random.split(key, 5)

    N, Cin, H, Wd = 2, 4, 16, 16
    Cout, K = 8, 3

    x = jax.random.normal(kx, (N, Cin, H, Wd), jnp.float32)
    params = dict(
        weight=0.1 * jax.random.normal(kw, (Cin, Cout, K, K), jnp.float32),
        bias=0.1 * jax.random.normal(kb, (Cout,), jnp.float32),
        gamma=1.0 + 0.1 * jax.random.normal(kg, (Cout,), jnp.float32),
        beta=0.1 * jax.random.normal(kbe, (Cout,), jnp.float32),
    )

    # Deterministic path check (use_dropout=False) against plain-JAX reference.
    y_nodrop = jax.block_until_ready(
        block_cnn_up(x, params, kernel=K, use_dropout=False))
    y_ref = reference_no_dropout(x, params, K=K)
    max_err = float(jnp.max(jnp.abs(y_nodrop - y_ref)))
    assert y_nodrop.shape == (N, Cout, H + K - 1, Wd + K - 1)
    assert max_err < 2e-3, f"mismatch vs reference: {max_err}"

    # Module-default path (use_dropout=True, training-mode inverted dropout).
    y = jax.block_until_ready(
        block_cnn_up(x, params, kernel=K, use_dropout=True,
                     dropval=0.5, seed=1234))
    assert y.shape == (N, Cout, H + K - 1, Wd + K - 1)
    assert bool(jnp.all(jnp.isfinite(y)))
    zero_frac = float(jnp.mean(y == 0.0))
    assert 0.35 < zero_frac < 0.65, f"dropout zero fraction off: {zero_frac}"

    print("KERNEL_OK")
</pallas_src>

<mosaic_0001>
module attributes {stable_mosaic.version = 11 : i64} {
  func.func @_fused_block_kernel(%arg0: i32, %arg1: memref<36x648xbf16, #tpu.memory_space<vmem>>, %arg2: memref<8x36xbf16, #tpu.memory_space<vmem>>, %arg3: memref<8x1xf32, #tpu.memory_space<vmem>>, %arg4: memref<8x1xf32, #tpu.memory_space<vmem>>, %arg5: memref<8x1xf32, #tpu.memory_space<vmem>>, %arg6: memref<8x648xf32, #tpu.memory_space<vmem>>, %arg7: memref<8x648xf32, #tpu.memory_space<vmem>>) attributes {dimension_semantics = [#tpu.dimension_semantics<arbitrary>], iteration_bounds = array<i64: 1>, scalar_prefetch = 0 : i64, scratch_operands = 0 : i64, tpu.core_type = #tpu.core_type<tc>, window_params = [{pipeline_mode = #tpu.pipeline_mode<synchronous>, transform_indices = @transform_0, window_bounds = array<i64: 36, 648>}, {pipeline_mode = #tpu.pipeline_mode<synchronous>, transform_indices = @transform_1, window_bounds = array<i64: 8, 36>}, {pipeline_mode = #tpu.pipeline_mode<synchronous>, transform_indices = @transform_2, window_bounds = array<i64: 8, 1>}, {pipeline_mode = #tpu.pipeline_mode<synchronous>, transform_indices = @transform_3, window_bounds = array<i64: 8, 1>}, {pipeline_mode = #tpu.pipeline_mode<synchronous>, transform_indices = @transform_4, window_bounds = array<i64: 8, 1>}, {pipeline_mode = #tpu.pipeline_mode<synchronous>, transform_indices = @transform_5, window_bounds = array<i64: 8, 648>}, {pipeline_mode = #tpu.pipeline_mode<synchronous>, transform_indices = @transform_6, window_bounds = array<i64: 8, 648>}]} {
    %c0 = arith.constant 0 : index
    %c0_0 = arith.constant 0 : index
    %0 = vector.load %arg2[%c0, %c0_0] : memref<8x36xbf16, #tpu.memory_space<vmem>>, vector<8x36xbf16>
    %c0_1 = arith.constant 0 : index
    %c0_2 = arith.constant 0 : index
    %1 = vector.load %arg1[%c0_1, %c0_2] : memref<36x648xbf16, #tpu.memory_space<vmem>>, vector<36x648xbf16>
    %cst = arith.constant dense<0.000000e+00> : vector<8x648xf32>
    %2 = tpu.matmul %0, %1, %cst {dimension_numbers = #tpu.dot_dimension_numbers<[1], [0], [0], [1], [0, 0, 1, 1], [], []>} : vector<8x36xbf16>, vector<36x648xbf16>, vector<8x648xf32> -> vector<8x648xf32>
    %c0_3 = arith.constant 0 : index
    %c0_4 = arith.constant 0 : index
    %3 = vector.load %arg3[%c0_3, %c0_4] : memref<8x1xf32, #tpu.memory_space<vmem>>, vector<8x1xf32>
    %4 = vector.broadcast %3 : vector<8x1xf32> to vector<8x648xf32>
    %5 = arith.addf %2, %4 : vector<8x648xf32>
    %cst_5 = arith.constant dense<0.000000e+00> : vector<8xf32>
    %6 = vector.multi_reduction <add>, %5, %cst_5 [1] : vector<8x648xf32> to vector<8xf32>
    %7 = vector.shape_cast %6 : vector<8xf32> to vector<8x1xf32>
    %cst_6 = arith.constant 0.00154320989 : f32
    %8 = vector.broadcast %cst_6 : f32 to vector<8x1xf32>
    %9 = arith.mulf %7, %8 : vector<8x1xf32>
    %10 = vector.broadcast %9 : vector<8x1xf32> to vector<8x648xf32>
    %11 = arith.subf %5, %10 : vector<8x648xf32>
    %12 = arith.mulf %11, %11 : vector<8x648xf32>
    %cst_7 = arith.constant dense<0.000000e+00> : vector<8xf32>
    %13 = vector.multi_reduction <add>, %12, %cst_7 [1] : vector<8x648xf32> to vector<8xf32>
    %14 = vector.shape_cast %13 : vector<8xf32> to vector<8x1xf32>
    %cst_8 = arith.constant 0.00154320989 : f32
    %15 = vector.broadcast %cst_8 : f32 to vector<8x1xf32>
    %16 = arith.mulf %14, %15 : vector<8x1xf32>
    %cst_9 = arith.constant 9.99999974E-6 : f32
    %17 = vector.broadcast %cst_9 : f32 to vector<8x1xf32>
    %18 = arith.addf %16, %17 : vector<8x1xf32>
    %19 = math.rsqrt %18 : vector<8x1xf32>
    %c0_10 = arith.constant 0 : index
    %c0_11 = arith.constant 0 : index
    %20 = vector.load %arg4[%c0_10, %c0_11] : memref<8x1xf32, #tpu.memory_space<vmem>>, vector<8x1xf32>
    %21 = arith.mulf %20, %19 : vector<8x1xf32>
    %22 = vector.broadcast %21 : vector<8x1xf32> to vector<8x648xf32>
    %23 = arith.mulf %11, %22 : vector<8x648xf32>
    %c0_12 = arith.constant 0 : index
    %c0_13 = arith.constant 0 : index
    %24 = vector.load %arg5[%c0_12, %c0_13] : memref<8x1xf32, #tpu.memory_space<vmem>>, vector<8x1xf32>
    %25 = vector.broadcast %24 : vector<8x1xf32> to vector<8x648xf32>
    %26 = arith.addf %23, %25 : vector<8x648xf32>
    %cst_14 = arith.constant 0.000000e+00 : f32
    %27 = vector.broadcast %cst_14 : f32 to vector<8x648xf32>
    %28 = arith.cmpf oge, %26, %27 : vector<8x648xf32>
    %cst_15 = arith.constant 2.000000e-01 : f32
    %29 = vector.broadcast %cst_15 : f32 to vector<8x648xf32>
    %30 = arith.mulf %29, %26 : vector<8x648xf32>
    %31 = arith.select %28, %26, %30 : vector<8x648xi1>, vector<8x648xf32>
    %c0_16 = arith.constant 0 : index
    %c0_17 = arith.constant 0 : index
    %32 = vector.load %arg7[%c0_16, %c0_17] : memref<8x648xf32, #tpu.memory_space<vmem>>, vector<8x648xf32>
    tpu.vector_store %arg7[%c0_16, %c0_17], %31 {strides = array<i32>} : memref<8x648xf32, #tpu.memory_space<vmem>>, vector<8x648xf32>,
    return
  }
  func.func @transform_0(%arg0: i32) -> (i32, i32) {
    %c0_i32 = arith.constant 0 : i32
    %c0_i32_0 = arith.constant 0 : i32
    %c0_i32_1 = arith.constant 0 : i32
    return %c0_i32, %c0_i32_0 : i32, i32
  }
  func.func @transform_1(%arg0: i32) -> (i32, i32) {
    %c0_i32 = arith.constant 0 : i32
    %c0_i32_0 = arith.constant 0 : i32
    %c0_i32_1 = arith.constant 0 : i32
    return %c0_i32, %c0_i32_0 : i32, i32
  }
  func.func @transform_2(%arg0: i32) -> (i32, i32) {
    %c0_i32 = arith.constant 0 : i32
    %c0_i32_0 = arith.constant 0 : i32
    %c0_i32_1 = arith.constant 0 : i32
    return %c0_i32, %c0_i32_0 : i32, i32
  }
  func.func @transform_3(%arg0: i32) -> (i32, i32) {
    %c0_i32 = arith.constant 0 : i32
    %c0_i32_0 = arith.constant 0 : i32
    %c0_i32_1 = arith.constant 0 : i32
    return %c0_i32, %c0_i32_0 : i32, i32
  }
  func.func @transform_4(%arg0: i32) -> (i32, i32) {
    %c0_i32 = arith.constant 0 : i32
    %c0_i32_0 = arith.constant 0 : i32
    %c0_i32_1 = arith.constant 0 : i32
    return %c0_i32, %c0_i32_0 : i32, i32
  }
  func.func @transform_5(%arg0: i32) -> (i32, i32) {
    %c0_i32 = arith.constant 0 : i32
    %c0_i32_0 = arith.constant 0 : i32
    %c0_i32_1 = arith.constant 0 : i32
    return %c0_i32, %c0_i32_0 : i32, i32
  }
  func.func @transform_6(%arg0: i32) -> (i32, i32) {
    %c0_i32 = arith.constant 0 : i32
    %c0_i32_0 = arith.constant 0 : i32
    %c0_i32_1 = arith.constant 0 : i32
    return %c0_i32, %c0_i32_0 : i32, i32
  }
}

</mosaic_0001>

<bundles_post_ra>
// kernel: tpu_custom_call.1
= control target key start
LH: loop header
LB: loop body
LE: loop exit
PB: predicated region body
PF: predicated region fallthrough
CT: control target
= control target key end

     0   :  { %11 = vsyncpa [#allocation3], 0  ;;  %s595_s0 = inlined_call_operand.hbm [shape: bf16[36,648], index: 0, kind: input, shape index: {}]   ;;  %s596_s1 = inlined_call_operand.vmem [shape: bf16[8,36], index: 1, kind: input, shape index: {}]   ;;  %s597_s2 = inlined_call_operand.vmem [shape: f32[8,1], index: 2, kind: input, shape index: {}]   ;;  %s598_s3 = inlined_call_operand.vmem [shape: f32[8,1], index: 3, kind: input, shape index: {}]   ;;  %s599_s4 = inlined_call_operand.vmem [shape: f32[8,1], index: 4, kind: input, shape index: {}]   ;;  %s600_s5 = inlined_call_operand.hbm [shape: f32[8,648], index: 5, kind: input, shape index: {}]   ;;  %s601_s6 = inlined_call_operand.hbm [shape: f32[8,648], index: 6, kind: output, shape index: {}]  }
   0x1   :  { %12 = vsyncpa [#allocation6], 0 }
   0x2   :  { %13 = vsyncpa [#allocation4], 0  ;;  %s18_s23 = sshll.u32 %s595_s0, 4  ;;  %s517_s24 = smov [#allocation2]   ;;  %s19_s23 = int_to_ptr.hbm [resolvable:$true] %s18_s23 }
   0x3   :  { %s20_s25 = sshll.u32 %s517_s24, 4  ;;  %s40_s28 = sshll.u32 %s600_s5, 4  ;;  %s21_s25 = int_to_ptr.vmem [resolvable:$true] %s20_s25  ;;  %s41_s28 = int_to_ptr.hbm [resolvable:$true] %s40_s28 }
   0x4   :  { %s518_s29 = smov 384   ;;  %s519_s30 = smov 24  }
   0x5   :  { %26 = dma.hbm_to_vmem [thread:$0]  %s19_s23, 1920, %s21_s25, [#allocation3], %s518_s29, %s518_s29, %s519_s30  }
   0x6   :  { %s520_s7 = smov [#allocation5]  }
   0x7   :  { %s42_s8 = sshll.u32 %s520_s7, 4  ;;  %s43_s8 = int_to_ptr.vmem [resolvable:$true] %s42_s8 }
   0x8   :  { %45 = dma.hbm_to_vmem [thread:$0]  %s41_s28, 768, %s43_s8, [#allocation6]  }
   0x9   :  { %511 = dma.done.wait [#allocation3], 1920  }
   0xa   :  { %512 = vsyncadd [#allocation3], 4294965376 }
   0xb   :  { %513 = dma.done.wait [#allocation6], 768  }
   0xc   :  { %514 = vsyncadd [#allocation6], 4294966528  ;;  %v521_v0 = vmov 0   ;;  %v68_v1 = vld [vmem:[#allocation2 + $0x60] sm:$0x33]  ;;  %vm156_vm0 = vcmask 1041408  }
   0xd   :  { %434 = vset.pattern.permute.xlu0 %v521_v0  ;;  %435 = vset.pattern.permute.xlu1 %v521_v0  ;;  %v69_v2 = vld [vmem:[#allocation2 + $0x68] sm:$0x33]  ;;  %v116_v3 = vunpack.c.l.b16 %v68_v1  ;;  %v117_v4 = vunpack.c.h.b16 %v68_v1  ;;  %v388_v7 = vld [vmem:[#allocation2 + $0x30] sm:$0xf]  ;;  %v422_v13 = vld [vmem:[#allocation2 + $0x34] sm:$0xf] }
   0xe   :  { %436 = vset.pattern.permute.xlu2 %v521_v0  ;;  %v118_v5 = vunpack.c.l.b16 %v69_v2  ;;  %v119_v6 = vunpack.c.h.b16 %v69_v2  ;;  %v425_v8 = vld [vmem:[#allocation2 + $0x44] sm:$0xf0]  ;;  %v390_v14 = vld [vmem:[#allocation2 + $0x48] sm:$0xf0]  ;;  %v396_v15 = vld [vmem:[#allocation2 + $0x38] sm:$0xf] }
   0xf   :  { %v134_v9 = vpack.c.b16 %v116_v3, %v116_v3  ;;  %v135_v10 = vpack.c.b16 %v117_v4, %v117_v4  ;;  %v426_v16 = vld [vmem:[#allocation2 + $0x4c] sm:$0xf0]  ;;  %v423_v17 = vld [vmem:[#allocation2 + $0x3c] sm:$0xf]  ;;  %v398_v18 = vld [vmem:[#allocation2 + $0x50] sm:$0xf0]  ;;  %v389_v24 = vor.u32 %v425_v8, %v388_v7  ;;  %v393_v25 = vor.u32 %v422_v13, %v390_v14 }
  0x10   :  { %v136_v11 = vpack.c.b16 %v118_v5, %v118_v5  ;;  %v137_v12 = vpack.c.b16 %v119_v6, %v119_v6  ;;  %v364_v23 = vld [vmem:[#allocation2] sm:$0xf]  ;;  %v419_v26 = vld [vmem:[#allocation2 + $0x14] sm:$0xf0]  ;;  %v416_v27 = vld [vmem:[#allocation2 + $0x4] sm:$0xf]  ;;  %v397_v29 = vor.u32 %v426_v16, %v396_v15  ;;  %v401_v30 = vor.u32 %v423_v17, %v398_v18 }
  0x11   :  { %v158_v19 = vsel %vm156_vm0, %v134_v9, 0  ;;  %v161_v20 = vsel %vm156_vm0, %v135_v10, 0  ;;  %v366_v28 = vld [vmem:[#allocation2 + $0x18] sm:$0xf0]  ;;  %v372_v31 = vld [vmem:[#allocation2 + $0x8] sm:$0xf]  ;;  %v365_v39 = vor.u32 %v419_v26, %v364_v23 }
  0x12   :  { %v164_v21 = vsel %vm156_vm0, %v136_v11, 0  ;;  %v167_v22 = vsel %vm156_vm0, %v137_v12, 0  ;;  %180 = vmatpush.bf16.msra.mxu0 %v158_v19  ;;  %193 = vmatpush.bf16.msra.mxu1 %v161_v20  ;;  %v420_v32 = vld [vmem:[#allocation2 + $0x1c] sm:$0xf0]  ;;  %v70_v33 = vld [vmem:[#allocation2 + $0x70] sm:$0x33]  ;;  %v369_v40 = vor.u32 %v416_v27, %v366_v28 }
  0x13   :  { %206 = vmatpush.bf16.msra.mxu2 %v164_v21  ;;  %219 = vmatpush.bf16.msra.mxu3 %v167_v22  ;;  %v417_v34 = vld [vmem:[#allocation2 + $0xc] sm:$0xf]  ;;  %v374_v35 = vld [vmem:[#allocation2 + $0x20] sm:$0xf0]  ;;  %v120_v36 = vunpack.c.l.b16 %v70_v33  ;;  %v121_v37 = vunpack.c.h.b16 %v70_v33  ;;  %v373_v43 = vor.u32 %v420_v32, %v372_v31  ;;  %v404_v45 = vld [vmem:[#allocation2 + $0x40] sm:$0xf] }
  0x14   :  { %v71_v38 = vld [vmem:[%s597_s2] sm:$0xff]  ;;  %v377_v44 = vor.u32 %v417_v34, %v374_v35  ;;  %v427_v46 = vld [vmem:[#allocation2 + $0x54] sm:$0xf0]  ;;  %v406_v50 = vld [vmem:[#allocation2 + $0x58] sm:$0xf0]  ;;  %vm152_vm1 = vcmask 293888  }
  0x15   :  { %74 = vperm.xlu0 %434, %v71_v38   ;;  %v138_v41 = vpack.c.b16 %v120_v36, %v120_v36  ;;  %v139_v42 = vpack.c.b16 %v121_v37, %v121_v37  ;;  %v424_v49 = vld [vmem:[#allocation2 + $0x44] sm:$0xf]  ;;  %v55_v51 = vld [vmem:[%s596_s1] sm:$0xf]  ;;  %v405_v52 = vor.u32 %v427_v46, %v404_v45  ;;  %v380_v54 = vld [vmem:[#allocation2 + $0x10] sm:$0xf] }
  0x16   :  { %181 = vmatpush.bf16.msra.mxu0 %v389_v24  ;;  %194 = vmatpush.bf16.msra.mxu1 %v393_v25  ;;  %v409_v53 = vor.u32 %v424_v49, %v406_v50  ;;  %v421_v55 = vld [vmem:[#allocation2 + $0x24] sm:$0xf0]  ;;  %v418_v56 = vld [vmem:[#allocation2 + $0x14] sm:$0xf]  ;;  %v382_v57 = vld [vmem:[#allocation2 + $0x28] sm:$0xf0] }
  0x17   :  { %207 = vmatpush.bf16.msra.mxu2 %v397_v29  ;;  %220 = vmatpush.bf16.msra.mxu3 %v401_v30  ;;  %v170_v47 = vsel %vm156_vm0, %v138_v41, 0  ;;  %v173_v48 = vsel %vm156_vm0, %v139_v42, 0  ;;  %v381_v58 = vor.u32 %v421_v55, %v380_v54  ;;  %v385_v59 = vor.u32 %v418_v56, %v382_v57  ;;  %v308_v41 = vld [vmem:[%s599_s4] sm:$0xff]  ;;  %s351_s15 = sshll.u32 %s601_s6, 4  ;;  %s352_s15 = int_to_ptr.hbm [resolvable:$true] %s351_s15 }
  0x18   :  { %vm257_vm2 = vcmask 64512   ;;  %311 = vperm.xlu2 %436, %v308_v41  }
  0x1a   :  { %182 = vmatpush.bf16.msra.mxu0 %v365_v39  ;;  %195 = vmatpush.bf16.msra.mxu1 %v369_v40 }
  0x1b   :  { %208 = vmatpush.bf16.msra.mxu2 %v373_v43  ;;  %221 = vmatpush.bf16.msra.mxu3 %v377_v44 }
  0x1d   :  { %410 = vmatmul.msk.bf16.vlgmr.msra.gmra.mxu0 %vm152_vm1, %v55_v51  ;;  %411 = vmatmul.msk.bf16.vlgmr.msra.gmra.mxu1 %vm152_vm1, %v55_v51 }
  0x1e   :  { %232 = vmatpush.bf16.msrb.mxu0 %v170_v47  ;;  %245 = vmatpush.bf16.msrb.mxu1 %v173_v48 }
  0x1f   :  { %412 = vmatmul.msk.bf16.vlgmr.msra.gmra.mxu2 %vm152_vm1, %v55_v51  ;;  %413 = vmatmul.msk.bf16.vlgmr.msra.gmra.mxu3 %vm152_vm1, %v55_v51 }
  0x22   :  { %233 = vmatpush.bf16.msrb.mxu0 %v405_v52  ;;  %246 = vmatpush.bf16.msrb.mxu1 %v409_v53 }
  0x26   :  { %234 = vmatpush.bf16.msrb.mxu0 %v381_v58  ;;  %247 = vmatpush.bf16.msrb.mxu1 %v385_v59 }
  0x2d   :  { %414 = vmatmul.msk.bf16.vlgmr.msrb.gmra.mxu0 %vm152_vm1, %v55_v51  ;;  %415 = vmatmul.msk.bf16.vlgmr.msrb.gmra.mxu1 %vm152_vm1, %v55_v51  ;;  %v295_v51 = vld [vmem:[%s598_s3] sm:$0xff]  ;;  %s522_s3 = smov [#allocation7]  }
  0x2e   :  { %s349_s4 = sshll.u32 %s522_s3, 4  ;;  %s350_s4 = int_to_ptr.vmem [resolvable:$true] %s349_s4 }
  0x72   :  { %v312_v55 = vpop.permute.xlu2 %311 }
  0x87   :  { %v75_v62 = vpop.permute.xlu0 %74 }
  0x9a   :  { %v184_v60 = vpop.f32.mrf.mxu0  ;;  %v197_v61 = vpop.f32.mrf.mxu1 }
  0x9b   :  { %v185_v63 = vadd.f32 %v184_v60, %v75_v62  ;;  %v198_v0 = vadd.f32 %v197_v61, %v75_v62 }
  0x9d   :  { %v253_v6 = vadd.f32 %v198_v0, %v185_v63 }
  0xa2   :  { %v210_v1 = vpop.f32.mrf.mxu2  ;;  %v223_v2 = vpop.f32.mrf.mxu3 }
  0xa3   :  { %v186_v3 = vpop.f32.mrf.mxu0  ;;  %v199_v4 = vpop.f32.mrf.mxu1  ;;  %v211_v5 = vadd.f32 %v210_v1, %v75_v62  ;;  %v224_v8 = vadd.f32 %v223_v2, %v75_v62 }
  0xa5   :  { %v254_v7 = vadd.f32 %v253_v6, %v211_v5 }
  0xa7   :  { %v255_v13 = vadd.f32 %v254_v7, %v224_v8 }
  0xaa   :  { %v212_v9 = vpop.f32.mrf.mxu2  ;;  %v225_v10 = vpop.f32.mrf.mxu3 }
  0xab   :  { %v236_v11 = vpop.f32.mrf.mxu0  ;;  %v249_v12 = vpop.f32.mrf.mxu1 }
  0xac   :  { %v237_v14 = vadd.f32 %v236_v11, %v75_v62  ;;  %v250_v15 = vadd.f32 %v249_v12, %v75_v62 }
  0xae   :  { %v256_v16 = vadd.f32 %v255_v13, %v237_v14  ;;  %v258_v17 = vsel %vm257_vm2, %v250_v15, 0.0 }
  0xb0   :  { %v259_v18 = vadd.f32 %v258_v17, %v256_v16 }
  0xb2   :  { %260 = vadd.xlane.f32.xlu0 %v259_v18 }
  0xb3   :  { %v238_v19 = vpop.f32.mrf.mxu0  ;;  %v251_v20 = vpop.f32.mrf.mxu1 }
 0x125   :  { %v261_v21 = vpop.xlane.xlu0 %260 }
 0x126   :  { %v262_v22 = vmul.f32 0.0015432099, %v261_v21 }
 0x128   :  { %v263_v23 = vsub.f32 %v185_v63, %v262_v22  ;;  %v264_v24 = vsub.f32 %v198_v0, %v262_v22  ;;  %v265_v25 = vsub.f32 %v211_v5, %v262_v22  ;;  %v266_v26 = vsub.f32 %v224_v8, %v262_v22 }
 0x129   :  { %v268_v29 = vsub.f32 %v250_v15, %v262_v22  ;;  %v267_v30 = vsub.f32 %v237_v14, %v262_v22 }
 0x12a   :  { %v269_v27 = vmul.f32 %v263_v23, %v263_v23  ;;  %v270_v28 = vmul.f32 %v264_v24, %v264_v24  ;;  %v271_v31 = vmul.f32 %v265_v25, %v265_v25  ;;  %v272_v33 = vmul.f32 %v266_v26, %v266_v26 }
 0x12b   :  { %v274_v35 = vmul.f32 %v268_v29, %v268_v29  ;;  %v273_v36 = vmul.f32 %v267_v30, %v267_v30 }
 0x12c   :  { %v275_v32 = vadd.f32 %v270_v28, %v269_v27 }
 0x12d   :  { %v279_v39 = vsel %vm257_vm2, %v274_v35, 0.0 }
 0x12e   :  { %v276_v34 = vadd.f32 %v275_v32, %v271_v31 }
 0x130   :  { %v277_v37 = vadd.f32 %v276_v34, %v272_v33 }
 0x132   :  { %v278_v38 = vadd.f32 %v277_v37, %v273_v36 }
 0x134   :  { %v280_v40 = vadd.f32 %v279_v39, %v278_v38 }
 0x136   :  { %281 = vadd.xlane.f32.xlu1 %v280_v40 }
 0x1a9   :  { %v282_v42 = vpop.xlane.xlu1 %281 }
 0x1aa   :  { %v283_v43 = vmul.f32 0.0015432099, %v282_v42 }
 0x1ac   :  { %v284_v44 = vadd.f32 1e-05, %v283_v43 }
 0x1ae   :  { %437 = vrsqrt.f32 %v284_v44  ;;  %vm291_vm4 = vweird.f32 %v284_v44 }
 0x1b4   :  { %v438_v45 = vpop.eup %437 }
 0x1b5   :  { %v286_v46 = vmul.f32 %v438_v45, %v284_v44  ;;  %vm292_vm3 = vweird.f32 %v438_v45 }
 0x1b6   :  { %vm293_vm5 = vmor %vm291_vm4, %vm292_vm3 }
 0x1b7   :  { %v287_v47 = vmul.f32 %v438_v45, %v286_v46 }
 0x1b9   :  { %v288_v48 = vmul.f32 0.5, %v287_v47 }
 0x1bb   :  { %v289_v49 = vsub.f32 1.5, %v288_v48 }
 0x1bd   :  { %v290_v50 = vmul.f32 %v438_v45, %v289_v49 }
 0x1bf   :  { %v294_v52 = vsel %vm293_vm5, %v438_v45, %v290_v50 }
 0x1c0   :  { %v296_v53 = vmul.f32 %v295_v51, %v294_v52 }
 0x1c2   :  { %299 = vperm.xlu1 %435, %v296_v53  }
 0x234   :  { %v300_v54 = vpop.permute.xlu1 %299 }
 0x235   :  { %v302_v56 = vmul.f32 %v300_v54, %v263_v23  ;;  %v303_v57 = vmul.f32 %v300_v54, %v264_v24  ;;  %v304_v58 = vmul.f32 %v300_v54, %v265_v25  ;;  %v305_v59 = vmul.f32 %v300_v54, %v266_v26 }
 0x236   :  { %v306_v60 = vmul.f32 %v300_v54, %v267_v30  ;;  %v307_v61 = vmul.f32 %v300_v54, %v268_v29 }
 0x237   :  { %v314_v62 = vadd.f32 %v312_v55, %v302_v56  ;;  %v315_v63 = vadd.f32 %v312_v55, %v303_v57  ;;  %v316_v0 = vadd.f32 %v312_v55, %v304_v58  ;;  %v317_v1 = vadd.f32 %v312_v55, %v305_v59 }
 0x238   :  { %v318_v2 = vadd.f32 %v312_v55, %v306_v60  ;;  %v319_v3 = vadd.f32 %v312_v55, %v307_v61 }
 0x239   :  { %vm320_vm6 = vcmp.ge.f32.partialorder %v314_v62, 0.0  ;;  %vm321_vm7 = vcmp.ge.f32.partialorder %v315_v63, 0.0  ;;  %vm322_vm8 = vcmp.ge.f32.partialorder %v316_v0, 0.0  ;;  %vm323_vm9 = vcmp.ge.f32.partialorder %v317_v1, 0.0 }
 0x23a   :  { %vm324_vm10 = vcmp.ge.f32.partialorder %v318_v2, 0.0  ;;  %v326_v4 = vmul.f32 0.2, %v314_v62  ;;  %v327_v5 = vmul.f32 0.2, %v315_v63  ;;  %vm325_vm11 = vcmp.ge.f32.partialorder %v319_v3, 0.0 }
 0x23b   :  { %v328_v6 = vmul.f32 0.2, %v316_v0  ;;  %v329_v7 = vmul.f32 0.2, %v317_v1  ;;  %v330_v8 = vmul.f32 0.2, %v318_v2 }
 0x23c   :  { %v331_v9 = vmul.f32 0.2, %v319_v3  ;;  %v332_v10 = vsel %vm320_vm6, %v314_v62, %v326_v4  ;;  %v333_v11 = vsel %vm321_vm7, %v315_v63, %v327_v5 }
 0x23d   :  { %v334_v12 = vsel %vm322_vm8, %v316_v0, %v328_v6  ;;  %v335_v13 = vsel %vm323_vm9, %v317_v1, %v329_v7  ;;  %338 = vst [vmem:[#allocation7] sm:$0xff] %v332_v10  ;;  %v336_v14 = vsel %vm324_vm10, %v318_v2, %v330_v8 }
 0x23e   :  { %339 = vst [vmem:[#allocation7 + $0x8] sm:$0xff] %v333_v11  ;;  %v337_v15 = vsel %vm325_vm11, %v319_v3, %v331_v9 }
 0x23f   :  { %340 = vst [vmem:[#allocation7 + $0x10] sm:$0xff] %v334_v12 }
 0x240   :  { %341 = vst [vmem:[#allocation7 + $0x18] sm:$0xff] %v335_v13 }
 0x241   :  { %342 = vst [vmem:[#allocation7 + $0x20] sm:$0xff] %v336_v14 }
 0x242   :  { %343 = vst.msk [vmem:[#allocation7 + $0x28] sm:$0xff] %vm257_vm2, %v337_v15 }
 0x243   :  { %354 = dma.vmem_to_hbm [thread:$0]  %s350_s4, 768, %s352_s15, [#allocation4]  }
 0x244   :  { %515 = dma.done.wait [#allocation4], 768  }
 0x245   :  { %516 = vsyncadd [#allocation4], 4294966528 }
 0x246   :  { %359 = vsyncpa [#allocation3], 1 }
 0x247   :  { %360 = vsyncpa [#allocation6], 1 }
 0x248   :  { %361 = vsyncpa [#allocation4], 1 }

</bundles_post_ra>
